<compile_context>
chip_gen: v6e
topology: v6e:2x2x1
jax: 0.10.0
libtpu: 0.0.40
codegen_flags: <defaults>
</compile_context>

<pallas_src>
import functools

import jax
import jax.numpy as jnp
from jax import lax
from jax.experimental import pallas as pl
from jax.experimental.pallas import tpu as pltpu


def _round_up(a, b):
    return (a + b - 1) // b * b


def _cdiv(a, b):
    return (a + b - 1) // b


# ------------------ pass 1: conv matmul -> per-tile BN partial stats ------------------
def _conv_stats_kernel(x2_ref, w_ref, st_ref):
    # x2_ref: (TILE_LP, KC_pad)    im2col rows for this tile (bf16 or f32)
    # w_ref : (KC_pad, C_out_pad)  flattened conv weights (taps folded into contraction)
    # st_ref: (1, 2, C_out_pad)    row 0 = sum, row 1 = sum of squares (per-tile partials)
    ct = jnp.dot(x2_ref[...], w_ref[...], preferred_element_type=jnp.float32)
    s = jnp.sum(ct, axis=0, keepdims=True)           # (1, C_out_pad)
    ss = jnp.sum(ct * ct, axis=0, keepdims=True)      # (1, C_out_pad)
    st_ref[0] = jnp.concatenate([s, ss], axis=0)


# -------- pass 2: conv matmul (recomputed) + BN affine + ReLU + MaxPool (fused) --------
def _conv_bn_relu_pool_kernel(x2_ref, w_ref, scale_ref, shift_ref, out_ref, *,
                              pool, tile_lo):
    # x2_ref   : (TILE_LP, KC_pad)
    # w_ref    : (KC_pad, C_out_pad)
    # scale_ref: (1, C_out_pad)   gamma / sqrt(var+eps)
    # shift_ref: (1, C_out_pad)   beta - mean*scale (conv bias folded in / cancelled)
    # out_ref  : (TILE_LO, C_out_pad)
    ct = jnp.dot(x2_ref[...], w_ref[...], preferred_element_type=jnp.float32)
    y = jnp.maximum(ct * scale_ref[...] + shift_ref[...], 0.0)
    if pool > 1:
        # reshape-based pooling: rows grouped into consecutive windows of `pool`
        y = jnp.max(y.reshape(tile_lo, pool, y.shape[-1]), axis=1)
    out_ref[...] = y.astype(out_ref.dtype)


def cbr_forward(x, weight, bias, gamma, beta, *, dilation, pool, eps=1e-5,
                matmul_dtype=jnp.bfloat16):
    """CBR forward with PyTorch training-mode BatchNorm semantics.

    x: (N, C_in, L) float32, PyTorch NCL layout.
    weight: (C_out, C_in, K) torch Conv1d layout.
    Returns (N, C_out, L_out) float32, L_out = floor(L_conv / pool).
    """
    N, C_in, L = x.shape
    C_out, _, K = weight.shape
    pad = int((K + (K - 1) * (dilation - 1)) / 2)
    L_conv = L + 2 * pad - dilation * (K - 1)
    L_out = L_conv // pool
    assert L_conv >= 1 and L_out >= 1

    f32 = jnp.float32
    mm_bytes = jnp.dtype(matmul_dtype).itemsize

    KC = K * C_in
    KC_pad = _round_up(KC, 128)        # lane-dense contraction dim
    C_out_pad = _round_up(C_out, 128)  # lane-dense output channels (unmasked stores)

    # --- tile sizing: pooled rows per tile, multiple of 8, bounded by a VMEM budget ---
    budget = 12 * 1024 * 1024          # per-tile (single-buffer) working-set budget
    tile_lo = 8
    for cand in (1024, 512, 256, 128, 64, 32, 16, 8):
        tlp = cand * pool
        ws = (tlp * KC_pad * mm_bytes        # x2 tile
              + tlp * C_out_pad * 4          # conv intermediate (f32 values)
              + cand * C_out_pad * 4)        # pooled output tile
        if ws <= budget:
            tile_lo = cand
            break
    tile_lo = max(8, min(tile_lo, _round_up(_cdiv(L_conv, pool), 8)))
    tile_lp = tile_lo * pool                 # conv rows per tile (pool divides it exactly)
    num_lt = _cdiv(L_conv, tile_lp)
    L1 = num_lt * tile_lp                    # zero-padded per-sample conv length
    R_tiles = N * num_lt                     # collapsed (N, L)-tile grid

    # --- wrapper-side layout prep (XLA): NCL -> NLC, zero-pad, im2col over K taps ---
    x_nlc = jnp.transpose(x, (0, 2, 1)).astype(matmul_dtype)      # (N, L, C_in)
    x_zp = jnp.pad(x_nlc, ((0, 0), (pad, pad), (0, 0)))           # (N, L+2pad, C_in)
    taps = [lax.slice_in_dim(x_zp, k * dilation, k * dilation + L_conv, axis=1)
            for k in range(K)]
    x2 = jnp.concatenate(taps, axis=-1)                           # (N, L_conv, K*C_in)
    x2 = jnp.pad(x2, ((0, 0), (0, L1 - L_conv), (0, KC_pad - KC)))
    x2 = x2.reshape(N * L1, KC_pad)                               # collapsed row axis

    w_flat = jnp.transpose(weight, (2, 1, 0)).reshape(KC, C_out)  # [k*C_in + c, o]
    w_flat = jnp.pad(w_flat, ((0, KC_pad - KC), (0, C_out_pad - C_out)))
    w_flat = w_flat.astype(matmul_dtype)

    # --- VMEM limit sized from the double-buffered working set (v5e default is ~16 MiB) ---
    ws1 = (2 * tile_lp * KC_pad * mm_bytes
           + 2 * KC_pad * C_out_pad * mm_bytes
           + 2 * 2 * C_out_pad * 4)
    ws2 = (2 * tile_lp * KC_pad * mm_bytes
           + 2 * KC_pad * C_out_pad * mm_bytes
           + 4 * C_out_pad * 4
           + 2 * tile_lo * C_out_pad * 4
           + tile_lp * C_out_pad * 4)
    vmem_limit = int(min(64 * 1024 * 1024,
                         max(32 * 1024 * 1024, int(1.5 * max(ws1, ws2)))))
    cparams = pltpu.CompilerParams(dimension_semantics=("parallel",),
                                   vmem_limit_bytes=vmem_limit)

    # ---------------- pass 1: per-tile sum / sum-of-squares partials only ----------------
    st = pl.pallas_call(
        _conv_stats_kernel,
        grid=(R_tiles,),
        in_specs=[
            pl.BlockSpec((tile_lp, KC_pad), lambda r: (r, 0)),
            pl.BlockSpec((KC_pad, C_out_pad), lambda r: (0, 0)),
        ],
        out_specs=pl.BlockSpec((1, 2, C_out_pad), lambda r: (r, 0, 0)),
        out_shape=jax.ShapeDtypeStruct((R_tiles, 2, C_out_pad), f32),
        compiler_params=cparams,
    )(x2, w_flat)

    # ---------- tiny per-channel finalize (cross-tile reduction) in plain JAX ----------
    count = jnp.asarray(N * L_conv, f32)             # zero-padded rows contribute 0
    sum_c = jnp.sum(st[:, 0, :], axis=0)             # (C_out_pad,)
    sumsq_c = jnp.sum(st[:, 1, :], axis=0)
    mean_c = sum_c / count                           # mean of bias-free conv
    var = jnp.maximum(sumsq_c / count - mean_c * mean_c, 0.0)   # biased variance

    bias_p = jnp.pad(bias.astype(f32), (0, C_out_pad - C_out))
    gamma_p = jnp.pad(gamma.astype(f32), (0, C_out_pad - C_out))
    beta_p = jnp.pad(beta.astype(f32), (0, C_out_pad - C_out))

    mean_y = mean_c + bias_p                         # mean of (conv + bias)
    scale = gamma_p * lax.rsqrt(var + eps)           # var(conv + bias) == var(conv)
    shift = (bias_p - mean_y) * scale + beta_p       # conv bias cancels under training BN
    scale2 = scale.reshape(1, C_out_pad)
    shift2 = shift.reshape(1, C_out_pad)

    # ------- pass 2: recompute conv matmul + BN affine + ReLU + MaxPool (fused) -------
    kernel2 = functools.partial(_conv_bn_relu_pool_kernel, pool=pool, tile_lo=tile_lo)
    out_flat = pl.pallas_call(
        kernel2,
        grid=(R_tiles,),
        in_specs=[
            pl.BlockSpec((tile_lp, KC_pad), lambda r: (r, 0)),
            pl.BlockSpec((KC_pad, C_out_pad), lambda r: (0, 0)),
            pl.BlockSpec((1, C_out_pad), lambda r: (0, 0)),
            pl.BlockSpec((1, C_out_pad), lambda r: (0, 0)),
        ],
        out_specs=pl.BlockSpec((tile_lo, C_out_pad), lambda r: (r, 0)),
        out_shape=jax.ShapeDtypeStruct((R_tiles * tile_lo, C_out_pad), f32),
        compiler_params=cparams,
    )(x2, w_flat, scale2, shift2)

    out_nlc = out_flat.reshape(N, num_lt * tile_lo, C_out_pad)[:, :L_out, :C_out]
    # TODO(synk): keep the surrounding model in NLC layout to drop this output transpose.
    return jnp.transpose(out_nlc, (0, 2, 1))         # back to (N, C_out, L_out)


if __name__ == "__main__":
    key = jax.random.PRNGKey(0)
    k1, k2, k3, k4, k5 = jax.random.split(key, 5)

    # small shapes consistent with the module: Conv1d on (N, C_in, L)
    N, C_in, L = 2, 4, 32
    C_out, K, dilation, pool = 8, 3, 2, 2

    x = jax.random.normal(k1, (N, C_in, L), jnp.float32)
    bound = 1.0 / (C_in * K) ** 0.5
    weight = jax.random.uniform(k2, (C_out, C_in, K), jnp.float32, -bound, bound)
    bias = jax.random.uniform(k3, (C_out,), jnp.float32, -bound, bound)
    gamma = jax.random.uniform(k4, (C_out,), jnp.float32, 0.5, 1.5)
    beta = jax.random.uniform(k5, (C_out,), jnp.float32, -0.1, 0.1)

    # pure-JAX reference (same training-mode BN semantics)
    pad = int((K + (K - 1) * (dilation - 1)) / 2)
    conv = lax.conv_general_dilated(x, weight, (1,), [(pad, pad)],
                                    rhs_dilation=(dilation,),
                                    dimension_numbers=("NCH", "OIH", "NCH"))
    conv = conv + bias[None, :, None]
    mean = conv.mean(axis=(0, 2), keepdims=True)
    var = ((conv - mean) ** 2).mean(axis=(0, 2), keepdims=True)
    bn = (conv - mean) / jnp.sqrt(var + 1e-5) * gamma[None, :, None] + beta[None, :, None]
    r = jnp.maximum(bn, 0.0)
    L_conv = conv.shape[-1]
    L_out = L_conv // pool
    ref = r[:, :, :L_out * pool].reshape(N, C_out, L_out, pool).max(-1)

    # f32 MXU path (tight numeric check)
    out_f32 = cbr_forward(x, weight, bias, gamma, beta, dilation=dilation, pool=pool,
                          matmul_dtype=jnp.float32)
    out_f32 = jax.block_until_ready(out_f32)
    assert out_f32.shape == ref.shape, (out_f32.shape, ref.shape)
    assert jnp.allclose(out_f32, ref, atol=1e-3, rtol=1e-3), "f32 mismatch vs reference"

    # bf16-input MXU path (default; native v6e/v7x MXU, f32 accumulation) — loose check
    out_bf16 = cbr_forward(x, weight, bias, gamma, beta, dilation=dilation, pool=pool)
    out_bf16 = jax.block_until_ready(out_bf16)
    assert out_bf16.shape == ref.shape
    assert jnp.allclose(out_bf16, ref, atol=1e-1, rtol=1e-1), "bf16 mismatch vs reference"

    print("KERNEL_OK")
</pallas_src>

<mosaic_0001>
module attributes {stable_mosaic.version = 11 : i64} {
  func.func @_conv_stats_kernel(%arg0: i32, %arg1: memref<32x128xf32, #tpu.memory_space<vmem>>, %arg2: memref<128x128xf32, #tpu.memory_space<vmem>>, %arg3: memref<1x2x128xf32, #tpu.memory_space<vmem>>) attributes {dimension_semantics = [#tpu.dimension_semantics<parallel>], iteration_bounds = array<i64: 2>, scalar_prefetch = 0 : i64, scratch_operands = 0 : i64, tpu.core_type = #tpu.core_type<tc>, window_params = [{transform_indices = @transform_0, window_bounds = array<i64: 32, 128>}, {pipeline_mode = #tpu.pipeline_mode<synchronous>, transform_indices = @transform_1, window_bounds = array<i64: 128, 128>}, {transform_indices = @transform_2, window_bounds = array<i64: 1, 2, 128>}]} {
    %c0 = arith.constant 0 : index
    %c0_0 = arith.constant 0 : index
    %0 = vector.load %arg1[%c0, %c0_0] : memref<32x128xf32, #tpu.memory_space<vmem>>, vector<32x128xf32>
    %c0_1 = arith.constant 0 : index
    %c0_2 = arith.constant 0 : index
    %1 = vector.load %arg2[%c0_1, %c0_2] : memref<128x128xf32, #tpu.memory_space<vmem>>, vector<128x128xf32>
    %cst = arith.constant dense<0.000000e+00> : vector<32x128xf32>
    %2 = tpu.matmul %0, %1, %cst {dimension_numbers = #tpu.dot_dimension_numbers<[1], [0], [0], [1], [0, 0, 1, 1], [], []>} : vector<32x128xf32>, vector<128x128xf32>, vector<32x128xf32> -> vector<32x128xf32>
    %cst_3 = arith.constant dense<0.000000e+00> : vector<128xf32>
    %3 = vector.multi_reduction <add>, %2, %cst_3 [0] : vector<32x128xf32> to vector<128xf32>
    %4 = vector.shape_cast %3 : vector<128xf32> to vector<1x128xf32>
    %5 = arith.mulf %2, %2 : vector<32x128xf32>
    %cst_4 = arith.constant dense<0.000000e+00> : vector<128xf32>
    %6 = vector.multi_reduction <add>, %5, %cst_4 [0] : vector<32x128xf32> to vector<128xf32>
    %7 = vector.shape_cast %6 : vector<128xf32> to vector<1x128xf32>
    %8 = tpu.concatenate %4, %7 in 0 : vector<1x128xf32>, vector<1x128xf32> -> vector<2x128xf32>
    %c0_5 = arith.constant 0 : index
    %c0_6 = arith.constant 0 : index
    %c0_7 = arith.constant 0 : index
    %9 = vector.load %arg3[%c0_5, %c0_6, %c0_7] : memref<1x2x128xf32, #tpu.memory_space<vmem>>, vector<1x2x128xf32>
    %10 = vector.shape_cast %9 : vector<1x2x128xf32> to vector<2x128xf32>
    %11 = vector.shape_cast %8 : vector<2x128xf32> to vector<1x2x128xf32>
    tpu.vector_store %arg3[%c0_5, %c0_6, %c0_7], %11 {strides = array<i32>} : memref<1x2x128xf32, #tpu.memory_space<vmem>>, vector<1x2x128xf32>,
    return
  }
  func.func @transform_0(%arg0: i32) -> (i32, i32) {
    %c0_i32 = arith.constant 0 : i32
    %c0_i32_0 = arith.constant 0 : i32
    return %arg0, %c0_i32 : i32, i32
  }
  func.func @transform_1(%arg0: i32) -> (i32, i32) {
    %c0_i32 = arith.constant 0 : i32
    %c0_i32_0 = arith.constant 0 : i32
    %c0_i32_1 = arith.constant 0 : i32
    return %c0_i32, %c0_i32_0 : i32, i32
  }
  func.func @transform_2(%arg0: i32) -> (i32, i32, i32) {
    %c0_i32 = arith.constant 0 : i32
    %c0_i32_0 = arith.constant 0 : i32
    %c0_i32_1 = arith.constant 0 : i32
    return %arg0, %c0_i32, %c0_i32_0 : i32, i32, i32
  }
}

</mosaic_0001>

<bundles_post_ra>
// kernel: tpu_custom_call.1
= control target key start
LH: loop header
LB: loop body
LE: loop exit
PB: predicated region body
PF: predicated region fallthrough
CT: control target
= control target key end

     0   :  { %7 = vsyncpa [#allocation3], 0  ;;  %s893_s0 = inlined_call_operand.hbm [shape: f32[64,128], index: 0, kind: input, shape index: {}]   ;;  %s894_s1 = inlined_call_operand.hbm [shape: f32[128,128], index: 1, kind: input, shape index: {}]   ;;  %s895_s2 = inlined_call_operand.hbm [shape: f32[2,2,128], index: 2, kind: output, shape index: {}]  }
   0x1   :  { %9 = vsyncpa [#allocation3 + $0x1], 0 }
   0x2   :  { %10 = vsyncpa [#allocation6], 0 }
   0x3   :  { %11 = vsyncpa [#allocation4], 0 }
   0x4   :  { %13 = vsyncpa [#allocation4 + $0x1], 0  ;;  %s711_s9 = smov 0   ;;  %s713_s10 = smov 0  }
   0x5   :  { %s715_s11 = smov 0   ;;  %s717_s12 = smov 0  }
   0x6 LB: > { %s732_s13 = sadd.s32 4294967295, %s689_s12   ;;  %s402_s14 = sadd.s32 4294967294, %s689_s12   ;;  %s689_s12 = sphi %s717_s12, %s917_s12   ;;  %s685_s11 = sphi %s715_s11, %s916_s11   ;;  %s681_s10 = sphi %s713_s10, %s915_s10   ;;  %s677_s9 = sphi %s711_s9, %s914_s9  }
   0x7   : > { %p39_p0 = scmp.ne.s32.totalorder %s681_s10, %s677_s9  ;;  %p896_p1 = scmp.eq.s32.totalorder %s732_s13, 0 }
   0x8   : > { %p90_p3 = scmp.eq.s32.totalorder %s402_s14, 1  ;;  %p403_p5 = scmp.ge.s32.totalorder %s689_s12, 1 }
   0x9   : > { %p741_p4 = por %p896_p1, %p39_p0  ;;  %p97_p7 = scmp.lt.s32.totalorder %s689_s12, 3 }
   0xa   : > { %p746_p6 = por %p90_p3, %p39_p0  ;;  %s691_s18 = smov [#allocation5]  }
   0xb   : > { %s900_s15 = scalar_select %p741_p4, 1, 0 }
   0xc   : > { %s901_s16 = scalar_select %p746_p6, 1, 0 }
   0xd   : > { %p751_p8 = pnand %p403_p5, %p97_p7  ;;  %s109_s19 = sshll.u32 %s691_s18, 4  ;;  %s110_s19 = int_to_ptr.vmem [resolvable:$true] %s109_s19 }
   0xe   : > { %s765_s21 = sadd.s32 1, %s689_s12   ;;  %s26_s22 = sadd.s32 1, %s685_s11 }
   0xf   : > { %s902_s17 = scalar_select %p751_p8, 1, 0 }
  0x10   : > { %p516_p9 = pneg %p751_p8  ;;  %s23_s23 = ssub.s32 %s689_s12, %s765_s21 }
  0x11   : > { %s578_s24 = scalar_lea.vmem %s110_s19, 2048  ;;  %p586_p5 = scmp.lt.s32.totalorder %s110_s19, %s110_s19 }
  0x12   : > { %p760_p11 = pnand %p516_p9, %p896_p1  ;;  %p579_p13 = scmp.ne.s32.totalorder %s110_s19, %s578_s24 }
  0x13   : > { %p587_p7 = scmp.lt.s32.totalorder %s578_s24, %s578_s24 }
  0x14   : > { %p569_p12 = pneg %p760_p11 }
  0x15   : > { %p588_p10 = por %p587_p7, %p586_p5 }
  0x16   : > { %p581_p0 = pnand %p579_p13, %p569_p12 }
  0x18   : > { %p582_p3 = pneg %p581_p0 }
  0x1a   : > { %p589_p2 = pnand %p588_p10, %p582_p3 }
  0x1c   : > { %592 = shalt.err (!%p589_p2)
}
  0x1d   : > { %s692_s25 = smov 128   ;;  %s693_s26 = smov 8  }
  0x1e   : > { %519 = dma.hbm_to_vmem [thread:$0]  (!%p760_p11), %s894_s1, 2048, %s110_s19, [#allocation6], %s692_s25, %s692_s25, %s693_s26  }
  0x1f   : > { %p24_p2 = scmp.eq.s32.totalorder %s23_s23, 0  ;;  %p33_p9 = scmp.ne.s32.totalorder %s685_s11, %s681_s10 }
  0x20   : > { %p34_p10 = scmp.eq.s32.totalorder %s689_s12, 0  ;;  %p529_p12 = scmp.lt.s32.totalorder %s689_s12, 2 }
  0x21   : > { %s785_s29 = scalar_select %p24_p2, %s685_s11, %s26_s22  }
  0x22   : > { %p35_p13 = por %p34_p10, %p33_p9  ;;  %p904_p0 = scmp.eq.s32.totalorder %s732_s13, 1 }
  0x23   : > { %s123_s3 = sand.u32 1, %s685_s11   ;;  %s417_s4 = sshll.u32 %s689_s12, 9 }
  0x24   : > { %p789_p3 = por %p904_p0, %p33_p9  ;;  %s406_s5 = sshll.u32 %s123_s3, 5 }
  0x25   : > { %s798_s8 = scalar_lea.hbm %s893_s0, %s417_s4  ;;  %s127_s14 = scalar_lea.vmem [#allocation2], %s406_s5 }
  0x26   : > { %s905_s30 = scalar_select %p789_p3, 1, 0 }
  0x27   : > { %s134_s18 = sshll.u32 %s127_s14, 4  ;;  %p800_p11 = pnand %p529_p12, %p35_p13  ;;  %s804_s18 = int_to_ptr.vmem [resolvable:$true] %s134_s18 }
  0x28   : > { %s806_s20 = scalar_lea.sflag [#allocation3], %s123_s3  ;;  %s593_s22 = scalar_lea.hbm %s798_s8, 512 }
  0x29   : > { %p594_p5 = scmp.ne.s32.totalorder %s798_s8, %s593_s22  ;;  %p595_p7 = pneg %p800_p11 }
  0x2a   : > { %s598_s27 = scalar_lea.hbm %s893_s0, 1024  ;;  %p599_p10 = scmp.lt.s32.totalorder %s798_s8, %s893_s0 }
  0x2b   : > { %p596_p2 = pnand %p595_p7, %p594_p5  ;;  %p600_p12 = scmp.lt.s32.totalorder %s598_s27, %s593_s22 }
  0x2d   : > { %p597_p9 = pneg %p596_p2  ;;  %p601_p13 = por %p600_p12, %p599_p10 }
  0x2f   : > { %p602_p0 = pnand %p601_p13, %p597_p9 }
  0x31   : > { %605 = shalt.err (!%p602_p0)
}
  0x32   : > { %s606_s3 = scalar_lea.vmem %s804_s18, 512  ;;  %s694_s5 = smov [#allocation2]  }
  0x33   : > { %p607_p1 = scmp.ne.s32.totalorder %s804_s18, %s606_s3  ;;  %s611_s6 = sshll.u32 %s694_s5, 4  ;;  %s612_s6 = int_to_ptr.vmem [resolvable:$false] %s611_s6 }
  0x34   : > { %s613_s7 = scalar_lea.vmem %s612_s6, 1024  ;;  %p614_p2 = scmp.lt.s32.totalorder %s804_s18, %s612_s6 }
  0x35   : > { %p609_p6 = pnand %p607_p1, %p595_p7  ;;  %p615_p3 = scmp.lt.s32.totalorder %s613_s7, %s606_s3 }
  0x37   : > { %p610_p5 = pneg %p609_p6  ;;  %p616_p4 = por %p615_p3, %p614_p2 }
  0x39   : > { %p617_p8 = pnand %p616_p4, %p610_p5 }
  0x3b   : > { %620 = shalt.err (!%p617_p8)
}
  0x3c   : > { %523 = dma.hbm_to_vmem [thread:$0]  (!%p800_p11), %s798_s8, 512, %s804_s18, %s806_s20, %s692_s25, %s692_s25, %s693_s26  }
  0x3d   : > { %p907_p1 = scmp.ne.s32.totalorder %s902_s17, 0 }
  0x3e   : > { %s833_s14 = sand.u32 (!%p907_p1), 1, %s681_s10   ;;  %p908_p4 = scmp.ne.s32.totalorder (!%p907_p1), %s900_s15, 0 }
  0x3f   : > { %146 = sbr.rel (%p907_p1) target bundleno = 335 (0x14f), region = 28  ;;  %s410_s22 = sshll.u32 (!%p907_p1), %s833_s14, 5 }
  0x40   : > { %s149_s23 = scalar_lea.sflag (!%p907_p1), [#allocation3], %s833_s14  ;;  %s837_s24 = scalar_lea.vmem (!%p907_p1), [#allocation2], %s410_s22 }
  0x44   : > { %664 = dma.done.wait (%p908_p4), %s149_s23, 512  }
  0x45   : > { %666 = vsyncadd (%p908_p4), %s149_s23, 4294966784  ;;  %p909_p6 = scmp.eq.s32.totalorder %s732_s13, 0 }
  0x47   : > { %668 = dma.done.wait (%p909_p6), [#allocation6], 2048   ;;  %p910_p8 = pmov %p909_p6 }
  0x48   : > { %v197_v0 = vld [vmem:[#allocation5 + $0x78] sm:$0xff]  ;;  %v196_v1 = vld [vmem:[#allocation5 + $0x70] sm:$0xff]  ;;  %v195_v2 = vld [vmem:[#allocation5 + $0x68] sm:$0xff]  ;;  %s412_s15 = sshll.u32 %s833_s14, 1  ;;  %s414_s17 = sshll.u32 %s732_s13, 5  ;;  %vm305_vm0 = vcmask 1040384  }
  0x49   : > { %670 = vsyncadd (%p910_p8), [#allocation6], 4294965248  ;;  %438 = vmatprep.subr.mxu0 %v197_v0  ;;  %476 = vmatprep.subr.mxu1 %v197_v0  ;;  %v194_v3 = vld [vmem:[#allocation5 + $0x60] sm:$0xff]  ;;  %v193_v4 = vld [vmem:[#allocation5 + $0x58] sm:$0xff]  ;;  %s176_s25 = scalar_lea.vmem [#allocation7], %s412_s15  ;;  %s856_s19 = scalar_lea.hbm %s895_s2, %s414_s17 }
  0x4a   : > { %439 = vmatpush3.msra.mxu0 %v197_v0  ;;  %492 = vmatpush3.msra.mxu1 %v197_v0  ;;  %v192_v5 = vld [vmem:[#allocation5 + $0x50] sm:$0xff]  ;;  %v191_v6 = vld [vmem:[#allocation5 + $0x48] sm:$0xff]  ;;  %v190_v7 = vld [vmem:[#allocation5 + $0x40] sm:$0xff]  ;;  %s322_s26 = sshll.u32 %s176_s25, 4  ;;  %s309_s20 = scalar_lea.sflag [#allocation4], %s833_s14  ;;  %s323_s26 = int_to_ptr.vmem [resolvable:$true] %s322_s26 }
  0x4b   : > { %440 = vmatprep.subr.mxu0 %v196_v1  ;;  %477 = vmatprep.subr.mxu1 %v196_v1  ;;  %v189_v8 = vld [vmem:[#allocation5 + $0x38] sm:$0xff]  ;;  %v188_v9 = vld [vmem:[#allocation5 + $0x30] sm:$0xff]  ;;  %v187_v10 = vld [vmem:[#allocation5 + $0x28] sm:$0xff]  ;;  %s621_s27 = scalar_lea.vmem %s323_s26, 32  ;;  %p911_p11 = scmp.ne.s32.totalorder %s905_s30, 0 }
  0x4c   : > { %441 = vmatpush3.msra.mxu0 %v196_v1  ;;  %493 = vmatpush3.msra.mxu1 %v196_v1  ;;  %v186_v11 = vld [vmem:[#allocation5 + $0x20] sm:$0xff]  ;;  %v185_v12 = vld [vmem:[#allocation5 + $0x18] sm:$0xff]  ;;  %v184_v13 = vld [vmem:[#allocation5 + $0x10] sm:$0xff]  ;;  %p622_p3 = scmp.ne.s32.totalorder %s323_s26, %s621_s27  ;;  %s695_s13 = smov [#allocation7]  }
  0x4d   : > { %442 = vmatprep.subr.mxu0 %v195_v2  ;;  %478 = vmatprep.subr.mxu1 %v195_v2  ;;  %v183_v14 = vld [vmem:[#allocation5 + $0x8] sm:$0xff]  ;;  %v182_v15 = vld [vmem:[#allocation5] sm:$0xff]  ;;  %v180_v17 = vld [vmem:[%s837_s24 + $0x10] sm:$0xff]  ;;  %s625_s28 = sshll.u32 %s695_s13, 4  ;;  %s626_s28 = int_to_ptr.vmem [resolvable:$false] %s625_s28 }
  0x4e   : > { %443 = vmatpush3.msra.mxu0 %v195_v2  ;;  %494 = vmatpush3.msra.mxu1 %v195_v2  ;;  %v178_v16 = vld [vmem:[%s837_s24] sm:$0xff]  ;;  %v179_v18 = vld [vmem:[%s837_s24 + $0x8] sm:$0xff]  ;;  %v181_v19 = vld [vmem:[%s837_s24 + $0x18] sm:$0xff]  ;;  %p623_p7 = pnand %p622_p3, %p911_p11  ;;  %s627_s4 = scalar_lea.vmem %s626_s28, 64 }
  0x4f   : > { %444 = vmatprep.subr.mxu0 %v194_v3  ;;  %479 = vmatprep.subr.mxu1 %v194_v3  ;;  %p628_p10 = scmp.lt.s32.totalorder %s323_s26, %s626_s28  ;;  %p629_p12 = scmp.lt.s32.totalorder %s627_s4, %s621_s27 }
  0x50   : > { %445 = vmatpush3.msra.mxu0 %v194_v3  ;;  %495 = vmatpush3.msra.mxu1 %v194_v3  ;;  %p624_p9 = pneg %p623_p7 }
  0x51   : > { %446 = vmatprep.subr.mxu0 %v193_v4  ;;  %480 = vmatprep.subr.mxu1 %v193_v4  ;;  %p630_p13 = por %p629_p12, %p628_p10 }
  0x52   : > { %447 = vmatpush3.msra.mxu0 %v193_v4  ;;  %496 = vmatpush3.msra.mxu1 %v193_v4 }
  0x53   : > { %448 = vmatprep.subr.mxu0 %v192_v5  ;;  %481 = vmatprep.subr.mxu1 %v192_v5  ;;  %p631_p0 = pnand %p630_p13, %p624_p9 }
  0x54   : > { %449 = vmatpush3.msra.mxu0 %v192_v5  ;;  %497 = vmatpush3.msra.mxu1 %v192_v5 }
  0x55   : > { %450 = vmatprep.subr.mxu0 %v191_v6  ;;  %482 = vmatprep.subr.mxu1 %v191_v6 }
  0x56   : > { %451 = vmatpush3.msra.mxu0 %v191_v6  ;;  %498 = vmatpush3.msra.mxu1 %v191_v6 }
  0x57   : > { %452 = vmatprep.subr.mxu0 %v190_v7  ;;  %483 = vmatprep.subr.mxu1 %v190_v7 }
  0x58   : > { %453 = vmatpush3.msra.mxu0 %v190_v7  ;;  %499 = vmatpush3.msra.mxu1 %v190_v7 }
  0x59   : > { %454 = vmatprep.subr.mxu0 %v189_v8  ;;  %484 = vmatprep.subr.mxu1 %v189_v8 }
  0x5a   : > { %455 = vmatpush3.msra.mxu0 %v189_v8  ;;  %500 = vmatpush3.msra.mxu1 %v189_v8 }
  0x5b   : > { %456 = vmatprep.subr.mxu0 %v188_v9  ;;  %485 = vmatprep.subr.mxu1 %v188_v9 }
  0x5c   : > { %457 = vmatpush3.msra.mxu0 %v188_v9  ;;  %501 = vmatpush3.msra.mxu1 %v188_v9 }
  0x5d   : > { %458 = vmatprep.subr.mxu0 %v187_v10  ;;  %486 = vmatprep.subr.mxu1 %v187_v10 }
  0x5e   : > { %459 = vmatpush3.msra.mxu0 %v187_v10  ;;  %502 = vmatpush3.msra.mxu1 %v187_v10 }
  0x5f   : > { %460 = vmatprep.subr.mxu0 %v186_v11  ;;  %487 = vmatprep.subr.mxu1 %v186_v11 }
  0x60   : > { %461 = vmatpush3.msra.mxu0 %v186_v11  ;;  %503 = vmatpush3.msra.mxu1 %v186_v11 }
  0x61   : > { %462 = vmatprep.subr.mxu0 %v185_v12  ;;  %488 = vmatprep.subr.mxu1 %v185_v12 }
  0x62   : > { %463 = vmatpush3.msra.mxu0 %v185_v12  ;;  %504 = vmatpush3.msra.mxu1 %v185_v12 }
  0x63   : > { %464 = vmatprep.subr.mxu0 %v184_v13  ;;  %489 = vmatprep.subr.mxu1 %v184_v13 }
  0x64   : > { %465 = vmatpush3.msra.mxu0 %v184_v13  ;;  %505 = vmatpush3.msra.mxu1 %v184_v13 }
  0x65   : > { %466 = vmatprep.subr.mxu0 %v183_v14  ;;  %490 = vmatprep.subr.mxu1 %v183_v14 }
  0x66   : > { %467 = vmatpush3.msra.mxu0 %v183_v14  ;;  %506 = vmatpush3.msra.mxu1 %v183_v14 }
  0x67   : > { %468 = vmatprep.subr.mxu0 %v182_v15  ;;  %491 = vmatprep.subr.mxu1 %v182_v15 }
  0x68   : > { %469 = vmatpush3.msra.mxu0 %v182_v15  ;;  %507 = vmatpush3.msra.mxu1 %v182_v15 }
  0x69   : > { %470 = vmatprep.mubr.f32.mxu0 %v178_v16  ;;  %473 = vmatprep.mubr.f32.mxu1 %v180_v17 }
  0x6a   : > { %471 = vmatmul.mubr.f32.vlgmr.msra.gmra.mxu0 %v179_v18  ;;  %474 = vmatmul.mubr.f32.vlgmr.msra.gmra.mxu1 %v181_v19 }
 0x12a   : > { %v472_v20 = vpop.f32.mrf.mxu0  ;;  %v475_v21 = vpop.f32.mrf.mxu1 }
 0x12b   : > { %v293_v24 = vmul.f32 %v472_v20, %v472_v20  ;;  %v295_v30 = vmul.f32 %v475_v21, %v475_v21 }
 0x12c   : > { %v264_v22 = vpop.f32.mrf.mxu0  ;;  %v274_v23 = vpop.f32.mrf.mxu1 }
 0x12d   : > { %v283_v25 = vadd.f32 %v472_v20, %v264_v22  ;;  %v292_v26 = vmul.f32 %v264_v22, %v264_v22  ;;  %v294_v29 = vmul.f32 %v274_v23, %v274_v23 }
 0x12f   : > { %v296_v27 = vadd.f32 %v293_v24, %v292_v26  ;;  %v284_v28 = vadd.f32 %v283_v25, %v274_v23 }
 0x131   : > { %v285_v31 = vadd.f32 %v475_v21, %v284_v28  ;;  %v297_v32 = vadd.f32 %v296_v27, %v294_v29 }
 0x133   : > { %v286_v33 = vrot.slane %v285_v31, 4  ;;  %v298_v34 = vadd.f32 %v297_v32, %v295_v30 }
 0x135   : > { %v287_v35 = vadd.f32 %v286_v33, %v285_v31  ;;  %v299_v36 = vrot.slane %v298_v34, 4 }
 0x137   : > { %v288_v37 = vrot.slane %v287_v35, 2  ;;  %v300_v38 = vadd.f32 %v299_v36, %v298_v34 }
 0x139   : > { %v289_v39 = vadd.f32 %v288_v37, %v287_v35  ;;  %v301_v40 = vrot.slane %v300_v38, 2 }
 0x13b   : > { %v290_v41 = vrot.slane %v289_v39, 1  ;;  %v302_v42 = vadd.f32 %v301_v40, %v300_v38 }
 0x13d   : > { %v303_v43 = vrot.slane %v302_v42, 1  ;;  %v291_v44 = vadd.f32 %v290_v41, %v289_v39 }
 0x13f   : > { %v304_v45 = vadd.f32 %v303_v43, %v302_v42 }
 0x141   : > { %v306_v46 = vsel %vm305_vm0, %v291_v44, %v304_v45 }
 0x142   : > { %307 = vst [vmem:[%s176_s25] sm:$0x3] %v306_v46 }
 0x143   : > { %634 = shalt.err (!%p631_p0)
}
 0x144   : > { %s635_s3 = scalar_lea.hbm %s856_s19, 32  ;;  %s639_s7 = scalar_lea.hbm %s895_s2, 64 }
 0x145   : > { %p636_p5 = scmp.ne.s32.totalorder %s856_s19, %s635_s3  ;;  %p640_p4 = scmp.lt.s32.totalorder %s856_s19, %s895_s2 }
 0x146   : > { %p641_p6 = scmp.lt.s32.totalorder %s639_s7, %s635_s3 }
 0x147   : > { %p637_p2 = pnand %p636_p5, %p911_p11 }
 0x148   : > { %p642_p8 = por %p641_p6, %p640_p4 }
 0x149   : > { %p638_p1 = pneg %p637_p2 }
 0x14b   : > { %p643_p3 = pnand %p642_p8, %p638_p1 }
 0x14d   : > { %646 = shalt.err (!%p643_p3)
}
 0x14e   : > { %514 = dma.vmem_to_hbm [thread:$0]  (%p911_p11), %s323_s26, 32, %s856_s19, %s309_s20  }
 0x14f PF: > { %s334_s23 = sand.u32 1, %s677_s9   ;;  %p912_p7 = scmp.ne.s32.totalorder %s901_s16, 0 }
 0x150   : > { %p913_p9 = scmp.ge.s32.totalorder %s689_s12, 2  ;;  %s335_s24 = scalar_lea.sflag [#allocation4], %s334_s23 }
 0x152   : > { %p525_p10 = pnand %p913_p9, %p912_p7 }
 0x154   : > { %p526_p12 = pneg %p525_p10 }
 0x156   : > { %672 = dma.done.wait (%p526_p12), %s335_s24, 32  }
 0x157   : > { %674 = vsyncadd (%p526_p12), %s335_s24, 4294967264  ;;  %p16_p13 = scmp.ge.s32.totalorder %s765_s21, 4   ;;  %s914_s9 = smov %s681_s10 }
 0x158   : > { %s915_s10 = smov %s685_s11  ;;  %s916_s11 = smov %s785_s29 }
 0x159   : > { %s917_s12 = smov %s765_s21  ;;  %18 = sbr.rel (!%p16_p13) target bundleno = 6 (0x6), region = 77 }
 0x15e   :  { %340 = vsyncpa [#allocation3], 1 }
 0x15f   :  { %342 = vsyncpa [#allocation3 + $0x1], 1 }
 0x160   :  { %343 = vsyncpa [#allocation6], 1 }
 0x161   :  { %344 = vsyncpa [#allocation4], 1 }
 0x162   :  { %346 = vsyncpa [#allocation4 + $0x1], 1 }

</bundles_post_ra>
